<compile_context>
chip_gen: v6e
topology: v6e:2x2x1
jax: 0.10.0
libtpu: 0.0.40
codegen_flags: <defaults>
</compile_context>

<pallas_src>
import jax
import jax.numpy as jnp
import numpy as np
from jax.experimental import pallas as pl
from jax.experimental.pallas import tpu as pltpu

T = 8            # seq len
B = 2            # batch
TB = T * B       # flattened rows, ordered (t, b)
E = 32           # embed dim
H = 4            # attention heads
HD = E // H      # head dim
FFN = 64         # encoder_ffn_embed_dim
SCALING = HD ** (-0.5)
LN_EPS = 1e-5
NEG = -1e30      # finite "-inf": exp() underflows to exactly 0, no inf-inf NaN risk


def encoder_layer_kernel(x_ref, bias_ref, w1_ref, b1_ref, w2_ref, b2_ref,
                         g_ref, beta_ref, out_ref):
    x = x_ref[...]                                                    # (TB, E), rows (t, b)

    # fc1: fused qkv + ffn projection, once over all B*T rows
    ins = jnp.dot(x, w1_ref[...], preferred_element_type=jnp.float32) + b1_ref[...]
    q = ins[:, 0:E] * SCALING
    k = ins[:, E:2 * E]
    v = ins[:, 2 * E:3 * E]
    ffn = jnp.maximum(ins[:, 3 * E:3 * E + FFN], 0.0)                 # relu (act. dropout = 0)

    # additive attention bias (block-diag same-batch + key padding), hoisted out of the loop
    bias = bias_ref[...]                                              # (TB, TB)

    # fc2 split: proj = attn @ w2[:E] + ffn @ w2[E:] + b2  (no concatenates)
    proj = jnp.dot(ffn, w2_ref[E:E + FFN, :],
                   preferred_element_type=jnp.float32) + b2_ref[...]  # (TB, E)

    for h in range(H):                                                # static loop over heads
        lo = h * HD
        qh = q[:, lo:lo + HD]                                         # (TB, HD)
        kh = k[:, lo:lo + HD]
        vh = v[:, lo:lo + HD]
        s = jax.lax.dot_general(qh, kh, (((1,), (1,)), ((), ())),
                                preferred_element_type=jnp.float32) + bias   # (TB, TB)
        s = s - jnp.max(s, axis=-1, keepdims=True)
        e = jnp.exp(s)
        p = e * pl.reciprocal(jnp.sum(e, axis=-1, keepdims=True), approx=True)
        av = jnp.dot(p, vh, preferred_element_type=jnp.float32)       # (TB, HD)
        # accumulate this head's fc2 contribution directly (replaces head concat)
        proj = proj + jnp.dot(av, w2_ref[lo:lo + HD, :],
                              preferred_element_type=jnp.float32)

    # residual add (dropout identity in eval) + post LayerNorm, once over all rows
    y = x + proj
    mean = jnp.mean(y, axis=-1, keepdims=True)
    yc = y - mean
    var = jnp.mean(yc * yc, axis=-1, keepdims=True)
    yn = yc * jax.lax.rsqrt(var + LN_EPS)
    out_ref[...] = yn * g_ref[...] + beta_ref[...]


def transformer_bm_encoder_layer(x_tbc, pad_mask, params):
    """x_tbc: (T, B, E) float32; pad_mask: (B, T) bool (1 = padded key). Returns (T, B, E)."""
    w1t, b1, w2t, b2, g, beta = params

    # free reshape (row-major): row i <-> (t = i // B, b = i % B)
    x2 = x_tbc.reshape(TB, E)

    # block-diagonal additive bias: query row i may attend key row j iff same batch element
    # and key j is not padded. Tiny (16x16) computation, fused by jit with the pallas_call.
    bvec = jnp.arange(TB, dtype=jnp.int32) % B
    same = bvec[:, None] == bvec[None, :]
    key_pad = pad_mask.T.reshape(TB)                                  # key_pad[j] = pad[b_j, t_j]
    bias = jnp.where(same & ~key_pad[None, :], 0.0, NEG).astype(jnp.float32)

    vmem = pl.BlockSpec(memory_space=pltpu.MemorySpace.VMEM)
    out = pl.pallas_call(
        encoder_layer_kernel,
        out_shape=jax.ShapeDtypeStruct((TB, E), jnp.float32),
        in_specs=[vmem] * 8,
        out_specs=vmem,
    )(x2, bias, w1t, b1, w2t, b2, g, beta)

    return out.reshape(T, B, E)                                       # free reshape back


def reference(x_tbc, pad_mask, params):
    """Pure-JAX reference mirroring the PyTorch forward (eval mode)."""
    w1t, b1, w2t, b2, g, beta = params
    ins = x_tbc @ w1t + b1                                            # (T, B, 3E+FFN)
    q = ins[..., :E] * SCALING
    k = ins[..., E:2 * E]
    v = ins[..., 2 * E:3 * E]
    ffn = jnp.maximum(ins[..., 3 * E:], 0.0)

    def split_heads(t):                                               # (T,B,E)->(B,H,T,HD)
        return jnp.transpose(t.reshape(T, B, H, HD), (1, 2, 0, 3))

    qh, kh, vh = split_heads(q), split_heads(k), split_heads(v)
    s = jnp.einsum('bhtd,bhsd->bhts', qh, kh)
    s = s + jnp.where(pad_mask[:, None, None, :], -jnp.inf, 0.0)
    p = jax.nn.softmax(s, axis=-1)
    a = jnp.einsum('bhts,bhsd->bhtd', p, vh)
    attn = jnp.transpose(a, (2, 0, 1, 3)).reshape(T, B, E)
    proj = jnp.concatenate([attn, ffn], axis=-1) @ w2t + b2
    y = x_tbc + proj
    mean = y.mean(-1, keepdims=True)
    var = ((y - mean) ** 2).mean(-1, keepdims=True)
    return (y - mean) / jnp.sqrt(var + LN_EPS) * g.reshape(-1) + beta.reshape(-1)


def make_params(key):
    """Deterministic synthetic parameters matching the module's shapes.
    fc1: Linear(E, 3E+FFN)  -> stored transposed as (E, 3E+FFN)
    fc2: Linear(E+FFN, E)   -> stored transposed as (E+FFN, E)
    layer_norm: weight/bias over E.
    """
    k1, k2, k3, k4, k5, k6 = jax.random.split(key, 6)
    w1t = jax.random.normal(k1, (E, 3 * E + FFN), jnp.float32) * (1.0 / np.sqrt(E))
    b1 = jax.random.normal(k2, (1, 3 * E + FFN), jnp.float32) * 0.02
    w2t = jax.random.normal(k3, (E + FFN, E), jnp.float32) * (1.0 / np.sqrt(E + FFN))
    b2 = jax.random.normal(k4, (1, E), jnp.float32) * 0.02
    g = 1.0 + 0.1 * jax.random.normal(k5, (1, E), jnp.float32)
    beta = 0.1 * jax.random.normal(k6, (1, E), jnp.float32)
    return (w1t, b1, w2t, b2, g, beta)


if __name__ == "__main__":
    key = jax.random.PRNGKey(0)
    kx, kp = jax.random.split(key)
    x = jax.random.normal(kx, (T, B, E), jnp.float32)                 # (seq, batch, embed)
    # padding: batch 0 has no padding, batch 1 pads the last two positions
    pad_mask = jnp.zeros((B, T), dtype=bool).at[1, T - 2:].set(True)
    params = make_params(kp)

    fwd = jax.jit(transformer_bm_encoder_layer)
    out = jax.block_until_ready(fwd(x, pad_mask, params))

    ref = reference(x, pad_mask, params)
    np.testing.assert_allclose(np.asarray(out), np.asarray(ref), rtol=2e-3, atol=2e-3)

    # TODO(synk): DynamicConv1dTBC / bm_norm branches are disabled by this config
    # (kernel_size=0, bm_norm=0) and therefore not implemented.
    print("KERNEL_OK")
</pallas_src>

<mosaic_0001>
module attributes {stable_mosaic.version = 11 : i64} {
  func.func @encoder_layer_kernel(%arg0: memref<16x32xf32, #tpu.memory_space<vmem>>, %arg1: memref<16x16xf32, #tpu.memory_space<vmem>>, %arg2: memref<32x160xf32, #tpu.memory_space<vmem>>, %arg3: memref<1x160xf32, #tpu.memory_space<vmem>>, %arg4: memref<96x32xf32, #tpu.memory_space<vmem>>, %arg5: memref<1x32xf32, #tpu.memory_space<vmem>>, %arg6: memref<1x32xf32, #tpu.memory_space<vmem>>, %arg7: memref<1x32xf32, #tpu.memory_space<vmem>>, %arg8: memref<16x32xf32, #tpu.memory_space<vmem>>) attributes {dimension_semantics = [], scalar_prefetch = 0 : i64, scratch_operands = 0 : i64, tpu.core_type = #tpu.core_type<tc>} {
    %c0 = arith.constant 0 : index
    %c0_0 = arith.constant 0 : index
    %0 = vector.load %arg0[%c0, %c0_0] : memref<16x32xf32, #tpu.memory_space<vmem>>, vector<16x32xf32>
    %c0_1 = arith.constant 0 : index
    %c0_2 = arith.constant 0 : index
    %1 = vector.load %arg2[%c0_1, %c0_2] : memref<32x160xf32, #tpu.memory_space<vmem>>, vector<32x160xf32>
    %cst = arith.constant dense<0.000000e+00> : vector<16x160xf32>
    %2 = tpu.matmul %0, %1, %cst {dimension_numbers = #tpu.dot_dimension_numbers<[1], [0], [0], [1], [0, 0, 1, 1], [], []>} : vector<16x32xf32>, vector<32x160xf32>, vector<16x160xf32> -> vector<16x160xf32>
    %c0_3 = arith.constant 0 : index
    %c0_4 = arith.constant 0 : index
    %3 = vector.load %arg3[%c0_3, %c0_4] : memref<1x160xf32, #tpu.memory_space<vmem>>, vector<1x160xf32>
    %4 = vector.broadcast %3 : vector<1x160xf32> to vector<16x160xf32>
    %5 = arith.addf %2, %4 : vector<16x160xf32>
    %6 = vector.extract_strided_slice %5 {offsets = [0, 0], sizes = [16, 32], strides = [1, 1]} : vector<16x160xf32> to vector<16x32xf32>
    %cst_5 = arith.constant 0.353553385 : f32
    %7 = vector.broadcast %cst_5 : f32 to vector<16x32xf32>
    %8 = arith.mulf %6, %7 : vector<16x32xf32>
    %9 = vector.extract_strided_slice %5 {offsets = [0, 32], sizes = [16, 32], strides = [1, 1]} : vector<16x160xf32> to vector<16x32xf32>
    %10 = vector.extract_strided_slice %5 {offsets = [0, 64], sizes = [16, 32], strides = [1, 1]} : vector<16x160xf32> to vector<16x32xf32>
    %11 = vector.extract_strided_slice %5 {offsets = [0, 96], sizes = [16, 64], strides = [1, 1]} : vector<16x160xf32> to vector<16x64xf32>
    %cst_6 = arith.constant 0.000000e+00 : f32
    %12 = vector.broadcast %cst_6 : f32 to vector<16x64xf32>
    %13 = arith.maximumf %11, %12 : vector<16x64xf32>
    %c0_7 = arith.constant 0 : index
    %c0_8 = arith.constant 0 : index
    %14 = vector.load %arg1[%c0_7, %c0_8] : memref<16x16xf32, #tpu.memory_space<vmem>>, vector<16x16xf32>
    %c32 = arith.constant 32 : index
    %c0_9 = arith.constant 0 : index
    %15 = vector.load %arg4[%c32, %c0_9] : memref<96x32xf32, #tpu.memory_space<vmem>>, vector<64x32xf32>
    %cst_10 = arith.constant dense<0.000000e+00> : vector<16x32xf32>
    %16 = tpu.matmul %13, %15, %cst_10 {dimension_numbers = #tpu.dot_dimension_numbers<[1], [0], [0], [1], [0, 0, 1, 1], [], []>} : vector<16x64xf32>, vector<64x32xf32>, vector<16x32xf32> -> vector<16x32xf32>
    %c0_11 = arith.constant 0 : index
    %c0_12 = arith.constant 0 : index
    %17 = vector.load %arg5[%c0_11, %c0_12] : memref<1x32xf32, #tpu.memory_space<vmem>>, vector<1x32xf32>
    %18 = vector.broadcast %17 : vector<1x32xf32> to vector<16x32xf32>
    %19 = arith.addf %16, %18 : vector<16x32xf32>
    %20 = vector.extract_strided_slice %8 {offsets = [0, 0], sizes = [16, 8], strides = [1, 1]} : vector<16x32xf32> to vector<16x8xf32>
    %21 = vector.extract_strided_slice %9 {offsets = [0, 0], sizes = [16, 8], strides = [1, 1]} : vector<16x32xf32> to vector<16x8xf32>
    %22 = vector.extract_strided_slice %10 {offsets = [0, 0], sizes = [16, 8], strides = [1, 1]} : vector<16x32xf32> to vector<16x8xf32>
    %cst_13 = arith.constant dense<0.000000e+00> : vector<16x16xf32>
    %23 = tpu.matmul %20, %21, %cst_13 {dimension_numbers = #tpu.dot_dimension_numbers<[1], [1], [0], [0], [0, 0, 1, 0], [], []>} : vector<16x8xf32>, vector<16x8xf32>, vector<16x16xf32> -> vector<16x16xf32>
    %24 = arith.addf %23, %14 : vector<16x16xf32>
    %cst_14 = arith.constant dense<0xFF800000> : vector<16xf32>
    %25 = vector.multi_reduction <maximumf>, %24, %cst_14 [1] : vector<16x16xf32> to vector<16xf32>
    %26 = vector.shape_cast %25 : vector<16xf32> to vector<16x1xf32>
    %27 = vector.broadcast %26 : vector<16x1xf32> to vector<16x16xf32>
    %28 = arith.subf %24, %27 : vector<16x16xf32>
    %29 = math.exp %28 : vector<16x16xf32>
    %cst_15 = arith.constant dense<0.000000e+00> : vector<16xf32>
    %30 = vector.multi_reduction <add>, %29, %cst_15 [1] : vector<16x16xf32> to vector<16xf32>
    %31 = vector.shape_cast %30 : vector<16xf32> to vector<16x1xf32>
    %32 = tpu.reciprocal %31 {approx = true} : vector<16x1xf32> -> vector<16x1xf32>
    %33 = vector.broadcast %32 : vector<16x1xf32> to vector<16x16xf32>
    %34 = arith.mulf %29, %33 : vector<16x16xf32>
    %cst_16 = arith.constant dense<0.000000e+00> : vector<16x8xf32>
    %35 = tpu.matmul %34, %22, %cst_16 {dimension_numbers = #tpu.dot_dimension_numbers<[1], [0], [0], [1], [0, 0, 1, 1], [], []>} : vector<16x16xf32>, vector<16x8xf32>, vector<16x8xf32> -> vector<16x8xf32>
    %c0_17 = arith.constant 0 : index
    %c0_18 = arith.constant 0 : index
    %36 = vector.load %arg4[%c0_17, %c0_18] : memref<96x32xf32, #tpu.memory_space<vmem>>, vector<8x32xf32>
    %cst_19 = arith.constant dense<0.000000e+00> : vector<16x32xf32>
    %37 = tpu.matmul %35, %36, %cst_19 {dimension_numbers = #tpu.dot_dimension_numbers<[1], [0], [0], [1], [0, 0, 1, 1], [], []>} : vector<16x8xf32>, vector<8x32xf32>, vector<16x32xf32> -> vector<16x32xf32>
    %38 = arith.addf %19, %37 : vector<16x32xf32>
    %39 = vector.extract_strided_slice %8 {offsets = [0, 8], sizes = [16, 8], strides = [1, 1]} : vector<16x32xf32> to vector<16x8xf32>
    %40 = vector.extract_strided_slice %9 {offsets = [0, 8], sizes = [16, 8], strides = [1, 1]} : vector<16x32xf32> to vector<16x8xf32>
    %41 = vector.extract_strided_slice %10 {offsets = [0, 8], sizes = [16, 8], strides = [1, 1]} : vector<16x32xf32> to vector<16x8xf32>
    %cst_20 = arith.constant dense<0.000000e+00> : vector<16x16xf32>
    %42 = tpu.matmul %39, %40, %cst_20 {dimension_numbers = #tpu.dot_dimension_numbers<[1], [1], [0], [0], [0, 0, 1, 0], [], []>} : vector<16x8xf32>, vector<16x8xf32>, vector<16x16xf32> -> vector<16x16xf32>
    %43 = arith.addf %42, %14 : vector<16x16xf32>
    %cst_21 = arith.constant dense<0xFF800000> : vector<16xf32>
    %44 = vector.multi_reduction <maximumf>, %43, %cst_21 [1] : vector<16x16xf32> to vector<16xf32>
    %45 = vector.shape_cast %44 : vector<16xf32> to vector<16x1xf32>
    %46 = vector.broadcast %45 : vector<16x1xf32> to vector<16x16xf32>
    %47 = arith.subf %43, %46 : vector<16x16xf32>
    %48 = math.exp %47 : vector<16x16xf32>
    %cst_22 = arith.constant dense<0.000000e+00> : vector<16xf32>
    %49 = vector.multi_reduction <add>, %48, %cst_22 [1] : vector<16x16xf32> to vector<16xf32>
    %50 = vector.shape_cast %49 : vector<16xf32> to vector<16x1xf32>
    %51 = tpu.reciprocal %50 {approx = true} : vector<16x1xf32> -> vector<16x1xf32>
    %52 = vector.broadcast %51 : vector<16x1xf32> to vector<16x16xf32>
    %53 = arith.mulf %48, %52 : vector<16x16xf32>
    %cst_23 = arith.constant dense<0.000000e+00> : vector<16x8xf32>
    %54 = tpu.matmul %53, %41, %cst_23 {dimension_numbers = #tpu.dot_dimension_numbers<[1], [0], [0], [1], [0, 0, 1, 1], [], []>} : vector<16x16xf32>, vector<16x8xf32>, vector<16x8xf32> -> vector<16x8xf32>
    %c8 = arith.constant 8 : index
    %c0_24 = arith.constant 0 : index
    %55 = vector.load %arg4[%c8, %c0_24] : memref<96x32xf32, #tpu.memory_space<vmem>>, vector<8x32xf32>
    %cst_25 = arith.constant dense<0.000000e+00> : vector<16x32xf32>
    %56 = tpu.matmul %54, %55, %cst_25 {dimension_numbers = #tpu.dot_dimension_numbers<[1], [0], [0], [1], [0, 0, 1, 1], [], []>} : vector<16x8xf32>, vector<8x32xf32>, vector<16x32xf32> -> vector<16x32xf32>
    %57 = arith.addf %38, %56 : vector<16x32xf32>
    %58 = vector.extract_strided_slice %8 {offsets = [0, 16], sizes = [16, 8], strides = [1, 1]} : vector<16x32xf32> to vector<16x8xf32>
    %59 = vector.extract_strided_slice %9 {offsets = [0, 16], sizes = [16, 8], strides = [1, 1]} : vector<16x32xf32> to vector<16x8xf32>
    %60 = vector.extract_strided_slice %10 {offsets = [0, 16], sizes = [16, 8], strides = [1, 1]} : vector<16x32xf32> to vector<16x8xf32>
    %cst_26 = arith.constant dense<0.000000e+00> : vector<16x16xf32>
    %61 = tpu.matmul %58, %59, %cst_26 {dimension_numbers = #tpu.dot_dimension_numbers<[1], [1], [0], [0], [0, 0, 1, 0], [], []>} : vector<16x8xf32>, vector<16x8xf32>, vector<16x16xf32> -> vector<16x16xf32>
    %62 = arith.addf %61, %14 : vector<16x16xf32>
    %cst_27 = arith.constant dense<0xFF800000> : vector<16xf32>
    %63 = vector.multi_reduction <maximumf>, %62, %cst_27 [1] : vector<16x16xf32> to vector<16xf32>
    %64 = vector.shape_cast %63 : vector<16xf32> to vector<16x1xf32>
    %65 = vector.broadcast %64 : vector<16x1xf32> to vector<16x16xf32>
    %66 = arith.subf %62, %65 : vector<16x16xf32>
    %67 = math.exp %66 : vector<16x16xf32>
    %cst_28 = arith.constant dense<0.000000e+00> : vector<16xf32>
    %68 = vector.multi_reduction <add>, %67, %cst_28 [1] : vector<16x16xf32> to vector<16xf32>
    %69 = vector.shape_cast %68 : vector<16xf32> to vector<16x1xf32>
    %70 = tpu.reciprocal %69 {approx = true} : vector<16x1xf32> -> vector<16x1xf32>
    %71 = vector.broadcast %70 : vector<16x1xf32> to vector<16x16xf32>
    %72 = arith.mulf %67, %71 : vector<16x16xf32>
    %cst_29 = arith.constant dense<0.000000e+00> : vector<16x8xf32>
    %73 = tpu.matmul %72, %60, %cst_29 {dimension_numbers = #tpu.dot_dimension_numbers<[1], [0], [0], [1], [0, 0, 1, 1], [], []>} : vector<16x16xf32>, vector<16x8xf32>, vector<16x8xf32> -> vector<16x8xf32>
    %c16 = arith.constant 16 : index
    %c0_30 = arith.constant 0 : index
    %74 = vector.load %arg4[%c16, %c0_30] : memref<96x32xf32, #tpu.memory_space<vmem>>, vector<8x32xf32>
    %cst_31 = arith.constant dense<0.000000e+00> : vector<16x32xf32>
    %75 = tpu.matmul %73, %74, %cst_31 {dimension_numbers = #tpu.dot_dimension_numbers<[1], [0], [0], [1], [0, 0, 1, 1], [], []>} : vector<16x8xf32>, vector<8x32xf32>, vector<16x32xf32> -> vector<16x32xf32>
    %76 = arith.addf %57, %75 : vector<16x32xf32>
    %77 = vector.extract_strided_slice %8 {offsets = [0, 24], sizes = [16, 8], strides = [1, 1]} : vector<16x32xf32> to vector<16x8xf32>
    %78 = vector.extract_strided_slice %9 {offsets = [0, 24], sizes = [16, 8], strides = [1, 1]} : vector<16x32xf32> to vector<16x8xf32>
    %79 = vector.extract_strided_slice %10 {offsets = [0, 24], sizes = [16, 8], strides = [1, 1]} : vector<16x32xf32> to vector<16x8xf32>
    %cst_32 = arith.constant dense<0.000000e+00> : vector<16x16xf32>
    %80 = tpu.matmul %77, %78, %cst_32 {dimension_numbers = #tpu.dot_dimension_numbers<[1], [1], [0], [0], [0, 0, 1, 0], [], []>} : vector<16x8xf32>, vector<16x8xf32>, vector<16x16xf32> -> vector<16x16xf32>
    %81 = arith.addf %80, %14 : vector<16x16xf32>
    %cst_33 = arith.constant dense<0xFF800000> : vector<16xf32>
    %82 = vector.multi_reduction <maximumf>, %81, %cst_33 [1] : vector<16x16xf32> to vector<16xf32>
    %83 = vector.shape_cast %82 : vector<16xf32> to vector<16x1xf32>
    %84 = vector.broadcast %83 : vector<16x1xf32> to vector<16x16xf32>
    %85 = arith.subf %81, %84 : vector<16x16xf32>
    %86 = math.exp %85 : vector<16x16xf32>
    %cst_34 = arith.constant dense<0.000000e+00> : vector<16xf32>
    %87 = vector.multi_reduction <add>, %86, %cst_34 [1] : vector<16x16xf32> to vector<16xf32>
    %88 = vector.shape_cast %87 : vector<16xf32> to vector<16x1xf32>
    %89 = tpu.reciprocal %88 {approx = true} : vector<16x1xf32> -> vector<16x1xf32>
    %90 = vector.broadcast %89 : vector<16x1xf32> to vector<16x16xf32>
    %91 = arith.mulf %86, %90 : vector<16x16xf32>
    %cst_35 = arith.constant dense<0.000000e+00> : vector<16x8xf32>
    %92 = tpu.matmul %91, %79, %cst_35 {dimension_numbers = #tpu.dot_dimension_numbers<[1], [0], [0], [1], [0, 0, 1, 1], [], []>} : vector<16x16xf32>, vector<16x8xf32>, vector<16x8xf32> -> vector<16x8xf32>
    %c24 = arith.constant 24 : index
    %c0_36 = arith.constant 0 : index
    %93 = vector.load %arg4[%c24, %c0_36] : memref<96x32xf32, #tpu.memory_space<vmem>>, vector<8x32xf32>
    %cst_37 = arith.constant dense<0.000000e+00> : vector<16x32xf32>
    %94 = tpu.matmul %92, %93, %cst_37 {dimension_numbers = #tpu.dot_dimension_numbers<[1], [0], [0], [1], [0, 0, 1, 1], [], []>} : vector<16x8xf32>, vector<8x32xf32>, vector<16x32xf32> -> vector<16x32xf32>
    %95 = arith.addf %76, %94 : vector<16x32xf32>
    %96 = arith.addf %0, %95 : vector<16x32xf32>
    %cst_38 = arith.constant dense<0.000000e+00> : vector<16xf32>
    %97 = vector.multi_reduction <add>, %96, %cst_38 [1] : vector<16x32xf32> to vector<16xf32>
    %98 = vector.shape_cast %97 : vector<16xf32> to vector<16x1xf32>
    %cst_39 = arith.constant 3.200000e+01 : f32
    %99 = vector.broadcast %cst_39 : f32 to vector<16x1xf32>
    %100 = arith.divf %98, %99 : vector<16x1xf32>
    %101 = vector.broadcast %100 : vector<16x1xf32> to vector<16x32xf32>
    %102 = arith.subf %96, %101 : vector<16x32xf32>
    %103 = arith.mulf %102, %102 : vector<16x32xf32>
    %cst_40 = arith.constant dense<0.000000e+00> : vector<16xf32>
    %104 = vector.multi_reduction <add>, %103, %cst_40 [1] : vector<16x32xf32> to vector<16xf32>
    %105 = vector.shape_cast %104 : vector<16xf32> to vector<16x1xf32>
    %cst_41 = arith.constant 3.200000e+01 : f32
    %106 = vector.broadcast %cst_41 : f32 to vector<16x1xf32>
    %107 = arith.divf %105, %106 : vector<16x1xf32>
    %cst_42 = arith.constant 9.99999974E-6 : f32
    %108 = vector.broadcast %cst_42 : f32 to vector<16x1xf32>
    %109 = arith.addf %107, %108 : vector<16x1xf32>
    %110 = math.rsqrt %109 : vector<16x1xf32>
    %111 = vector.broadcast %110 : vector<16x1xf32> to vector<16x32xf32>
    %112 = arith.mulf %102, %111 : vector<16x32xf32>
    %c0_43 = arith.constant 0 : index
    %c0_44 = arith.constant 0 : index
    %113 = vector.load %arg6[%c0_43, %c0_44] : memref<1x32xf32, #tpu.memory_space<vmem>>, vector<1x32xf32>
    %114 = vector.broadcast %113 : vector<1x32xf32> to vector<16x32xf32>
    %115 = arith.mulf %112, %114 : vector<16x32xf32>
    %c0_45 = arith.constant 0 : index
    %c0_46 = arith.constant 0 : index
    %116 = vector.load %arg7[%c0_45, %c0_46] : memref<1x32xf32, #tpu.memory_space<vmem>>, vector<1x32xf32>
    %117 = vector.broadcast %116 : vector<1x32xf32> to vector<16x32xf32>
    %118 = arith.addf %115, %117 : vector<16x32xf32>
    %c0_47 = arith.constant 0 : index
    %c0_48 = arith.constant 0 : index
    %119 = vector.load %arg8[%c0_47, %c0_48] : memref<16x32xf32, #tpu.memory_space<vmem>>, vector<16x32xf32>
    tpu.vector_store %arg8[%c0_47, %c0_48], %118 {strides = array<i32>} : memref<16x32xf32, #tpu.memory_space<vmem>>, vector<16x32xf32>,
    return
  }
}

</mosaic_0001>

<bundles_post_ra>
// kernel: transformer_bm_encoder_layer.1
= control target key start
LH: loop header
LB: loop body
LE: loop exit
PB: predicated region body
PF: predicated region fallthrough
CT: control target
= control target key end

     0   :  { %v1718_v4 = vmov 0.0   ;;  %s2020_s0 = inlined_call_operand.vmem [shape: f32[16,32], index: 0, kind: input, shape index: {}]   ;;  %s2021_s1 = inlined_call_operand.vmem [shape: f32[16,16], index: 1, kind: input, shape index: {}]   ;;  %s2022_s2 = inlined_call_operand.vmem [shape: f32[32,160], index: 2, kind: input, shape index: {}]   ;;  %s2023_s3 = inlined_call_operand.vmem [shape: f32[1,160], index: 3, kind: input, shape index: {}]   ;;  %s2024_s4 = inlined_call_operand.vmem [shape: f32[96,32], index: 4, kind: input, shape index: {}]   ;;  %s2025_s5 = inlined_call_operand.vmem [shape: f32[1,32], index: 5, kind: input, shape index: {}]   ;;  %s2026_s6 = inlined_call_operand.vmem [shape: f32[1,32], index: 6, kind: input, shape index: {}]   ;;  %s2027_s7 = inlined_call_operand.vmem [shape: f32[1,32], index: 7, kind: input, shape index: {}]   ;;  %s2028_s8 = inlined_call_operand.hbm [shape: f32[16,32], index: 8, kind: output, shape index: {}]  }
   0x1   :  { %v39_v0 = vld [vmem:[%s2022_s2 + $0x38] sm:$0xff]  ;;  %v38_v1 = vld [vmem:[%s2022_s2 + $0x30] sm:$0xff]  ;;  %v37_v2 = vld [vmem:[%s2022_s2 + $0x28] sm:$0xff]  ;;  %123 = vmatprep.mubr.f32.mxu0 %v1718_v4 }
   0x2   :  { %83 = vmatprep.subr.mxu0 %v39_v0  ;;  %v36_v3 = vld [vmem:[%s2022_s2 + $0x20] sm:$0xff]  ;;  %v35_v5 = vld [vmem:[%s2022_s2 + $0x18] sm:$0xff]  ;;  %v34_v6 = vld [vmem:[%s2022_s2 + $0x10] sm:$0xff] }
   0x3   :  { %84 = vmatpush1.msra.mxu0 %v38_v1 }
   0x4   :  { %85 = vmatprep.subr.mxu0 %v37_v2 }
   0x5   :  { %13 = vsyncpa [#allocation3], 0  ;;  %86 = vmatpush1.msra.mxu0 %v36_v3  ;;  %v33_v7 = vld [vmem:[%s2022_s2 + $0x8] sm:$0xff]  ;;  %v32_v8 = vld [vmem:[%s2022_s2] sm:$0xff]  ;;  %vm52_vm0 = vcmask 261120   ;;  %v42_v11 = vlaneseq  ;;  %vm259_vm1 = vcmask 64512  }
   0x6   :  { %87 = vmatprep.subr.mxu0 %v35_v5  ;;  %v1806_v9 = vld [vmem:[%s2020_s0] sm:$0xff]  ;;  %v1813_v10 = vld [vmem:[%s2020_s0 + $0x8] sm:$0xff]  ;;  %s1719_s0 = smov 96   ;;  %vm345_vm2 = vcmask 130048   ;;  %s1721_s29 = smov 120   ;;  %v151_v60 = vld [vmem:[%s2024_s4 + $0x58] sm:$0xff] }
   0x7   :  { %88 = vmatpush1.msra.mxu0 %v34_v6  ;;  %v1817_v12 = vshrl.u32 %v42_v11, 7  ;;  %v1823_v14 = vld [vmem:[%s2023_s3] sm:$0x3]  ;;  %v1858_v28 = vld [vmem:[%s2021_s1 + $0x8] sm:$0xff]  ;;  %s1722_s30 = smov 88   ;;  %s1723_s9 = smov 80   ;;  %1549 = vmatprep.subr.mxu1 %v151_v60 }
   0x8   :  { %89 = vmatprep.subr.mxu0 %v33_v7  ;;  %v1853_v27 = vld [vmem:[%s2021_s1] sm:$0xff]  ;;  %s1720_s1 = smov 64   ;;  %s1724_s10 = smov 112   ;;  %v150_v61 = vld [vmem:[%s2024_s4 + $0x50] sm:$0xff]  ;;  %1550 = vmatpush3.msra.mxu1 %v151_v60  ;;  %v149_v7 = vld [vmem:[%s2024_s4 + $0x48] sm:$0xff]  ;;  %vm173_vm3 = vcmask 523264  }
   0x9   :  { %90 = vmatpush1.msra.mxu0 %v32_v8  ;;  %v44_v13 = vsub.s32 0, %v1817_v12  ;;  %1551 = vmatprep.subr.mxu1 %v150_v61  ;;  %v48_v6 = vsub.s32 1, %v1817_v12  ;;  %v148_v8 = vld [vmem:[%s2024_s4 + $0x40] sm:$0xff]  ;;  %s1725_s23 = smov 32   ;;  %s1726_s27 = smov 56   ;;  %v739_v60 = vld [vmem:[%s2024_s4 + $0x8] sm:$0xff] }
   0xa   :  { %1456 = vmatmul.mubr.msk.f32.vlgmr.msra.gmra.mxu0 %vm52_vm0, %v1806_v9  ;;  %1552 = vmatpush3.msra.mxu1 %v150_v61  ;;  %s1727_s28 = smov 72   ;;  %s1730_s13 = smov 40  }
   0xb   :  { %129 = vmatprep.mubr.f32.mxu0 %v1718_v4  ;;  %v45_v15 = vrot.slane %v1823_v14, %v44_v13  ;;  %1553 = vmatprep.subr.mxu1 %v149_v7  ;;  %v49_v11 = vrot.slane %v1823_v14, %v48_v6  ;;  %v147_v13 = vld [vmem:[%s2024_s4 + $0x38] sm:$0xff]  ;;  %v145_v14 = vld [vmem:[%s2024_s4 + $0x28] sm:$0xff]  ;;  %s1731_s19 = smov [#allocation2]  }
   0xc   :  { %1554 = vmatpush3.msra.mxu1 %v149_v7  ;;  %s1445_s20 = sshll.u32 %s1731_s19, 4  ;;  %s1446_s20 = int_to_ptr.vmem [resolvable:$true] %s1445_s20 }
   0xd   :  { %1555 = vmatprep.subr.mxu1 %v148_v8  ;;  %s1696_s21 = scalar_lea.vmem %s1446_s20, 256  ;;  %p1701_p1 = scmp.lt.s32.totalorder %s1446_s20, %s1446_s20 }
   0xe   :  { %1457 = vmatmul.mubr.msk.f32.gmra.mxu0 %vm52_vm0, %v1813_v10  ;;  %1556 = vmatpush3.msra.mxu1 %v148_v8  ;;  %p1697_p0 = scmp.ne.s32.totalorder %s1446_s20, %s1696_s21  ;;  %p1702_p2 = scmp.lt.s32.totalorder %s1696_s21, %s1696_s21 }
   0xf   :  { %1557 = vmatprep.subr.mxu1 %v147_v13 }
  0x10   :  { %1558 = vmatpush3.msra.mxu1 %v147_v13  ;;  %p1703_p3 = por %p1702_p2, %p1701_p1 }
  0x12   :  { %p1704_p4 = pnand %p1703_p3, %p1697_p0 }
  0xca   :  { %v125_v16 = vpop.f32.mrf.mxu0 }
  0xcb   :  { %v1826_v17 = vadd.f32 %v125_v16, %v45_v15 }
  0xcc   :  { %v1828_v18 = vpop.f32.mrf.mxu0 }
  0xcd   :  { %v1831_v19 = vmul.f32 0.35355338, %v1826_v17  ;;  %v138_v12 = vmax.f32 %v1826_v17, 0.0  ;;  %v128_v16 = vadd.f32 %v1828_v18, %v49_v11  ;;  %v455_v18 = vld [vmem:[%s2024_s4] sm:$0xff] }
  0xce   :  { %v131_v20 = vpop.f32.mrf.mxu0 }
  0xcf   :  { %v1833_v21 = vadd.f32 %v131_v20, %v45_v15  ;;  %1572 = vmatprep.mubr.msk.f32.mxu0 %vm259_vm1, %v1831_v19  ;;  %v146_v15 = vld [vmem:[%s2024_s4 + $0x30] sm:$0xff]  ;;  %v144_v20 = vld [vmem:[%s2024_s4 + $0x20] sm:$0xff] }
  0xd0   :  { %v1848_v25 = vpop.f32.mrf.mxu0  ;;  %1559 = vmatprep.subr.mxu1 %v146_v15 }
  0xd1   :  { %257 = vrot.lane.b32.xlu0 %v1833_v21, %s1719_s0  ;;  %v1844_v24 = vmul.f32 0.35355338, %v1833_v21  ;;  %1560 = vmatpush3.msra.mxu1 %v146_v15 }
  0xd2   :  { %1561 = vmatprep.subr.mxu1 %v145_v14 }
  0xd3   :  { %1562 = vmatpush3.msra.mxu1 %v145_v14 }
  0xd4   :  { %1563 = vmatprep.subr.mxu1 %v144_v20 }
  0xd5   :  { %255 = vrot.lane.b32.xlu0 %v1826_v17, %s1719_s0  ;;  %1564 = vmatpush3.msra.mxu1 %v144_v20 }
  0xd6   :  { %1582 = vmatprep.subr.mxu1 %v455_v18 }
 0x143   :  { %v258_v22 = vpop.permute.xlu0 %257 }
 0x144   :  { %1568 = vmatprep.subr.msk.mxu0 %vm259_vm1, %v258_v22 }
 0x145   :  { %1569 = vmatpush3.xpose.msk.msra.mxu0 %vm259_vm1, %v258_v22  ;;  %v134_v22 = vadd.f32 %v1848_v25, %v49_v11 }
 0x147   :  { %v256_v23 = vpop.permute.xlu0 %255 }
 0x148   :  { %1570 = vmatprep.subr.msk.mxu0 %vm259_vm1, %v256_v23 }
 0x149   :  { %1571 = vmatpush3.xpose.msk.msra.mxu0 %vm259_vm1, %v256_v23  ;;  %v140_v23 = vmax.f32 %v1833_v21, 0.0 }
 0x14c   :  { %1573 = vmatmul.mubr.msk.f32.vlgmr.msra.gmra.mxu0 %vm259_vm1, %v1844_v24 }
 0x20c   :  { %v1574_v26 = vpop.f32.mrf.mxu0 }
 0x20d   :  { %v342_v31 = vadd.f32 %v1574_v26, %v1858_v28  ;;  %v139_v26 = vmax.f32 %v128_v16, 0.0 }
 0x20e   :  { %v336_v29 = vpop.f32.mrf.mxu0 }
 0x20f   :  { %v337_v30 = vadd.f32 %v336_v29, %v1853_v27  ;;  %v349_v33 = vsel %vm345_vm2, %v342_v31, -inf  ;;  %v141_v29 = vmax.f32 %v134_v22, 0.0 }
 0x211   :  { %v346_v32 = vsel %vm345_vm2, %v337_v30, -inf }
 0x212   :  { %347 = vmax.xlane.f32.xlu1 %v346_v32 }
 0x216   :  { %350 = vmax.xlane.f32.xlu1 %v349_v33 }
 0x29b   :  { %v348_v34 = vpop.xlane.xlu1 %347 }
 0x29c   :  { %v352_v35 = vsub.f32 %v337_v30, %v348_v34 }
 0x29e   :  { %v354_v36 = vmul.f32 1.442695, %v352_v35 }
 0x29f   :  { %v351_v37 = vpop.xlane.xlu1 %350 }
 0x2a0   :  { %1660 = vpow2.f32 %v354_v36  ;;  %v353_v38 = vsub.f32 %v342_v31, %v351_v37 }
 0x2a2   :  { %v356_v39 = vmul.f32 1.442695, %v353_v38 }
 0x2a4   :  { %1662 = vpow2.f32 %v356_v39 }
 0x2ad   :  { %v1661_v40 = vpop.eup %1660 }
 0x2ae   :  { %v358_v41 = vsel %vm345_vm2, %v1661_v40, 0.0 }
 0x2af   :  { %359 = vadd.xlane.f32.xlu0 %v358_v41 }
 0x2b1   :  { %v1663_v42 = vpop.eup %1662 }
 0x2b2   :  { %v361_v43 = vsel %vm345_vm2, %v1663_v42, 0.0 }
 0x2b3   :  { %362 = vadd.xlane.f32.xlu1 %v361_v43 }
 0x2c4   :  { %370 = vrot.lane.b32.xlu1 %v1833_v21, %s1720_s1 }
 0x2c5   :  { %539 = vrot.lane.b32.xlu0 %v1831_v19, %s1721_s29 }
 0x2c8   :  { %368 = vrot.lane.b32.xlu1 %v1826_v17, %s1720_s1  ;;  %s1728_s1 = smov 104  }
 0x2cc   :  { %545 = vrot.lane.b32.xlu1 %v1833_v21, %s1722_s30 }
 0x2d0   :  { %543 = vrot.lane.b32.xlu1 %v1826_v17, %s1722_s30 }
 0x2d4   :  { %541 = vrot.lane.b32.xlu1 %v1844_v24, %s1721_s29  ;;  %s1729_s29 = smov 48  }
 0x2d8   :  { %829 = vrot.lane.b32.xlu1 %v1833_v21, %s1723_s9 }
 0x2dc   :  { %827 = vrot.lane.b32.xlu1 %v1826_v17, %s1723_s9 }
 0x2e0   :  { %823 = vrot.lane.b32.xlu1 %v1831_v19, %s1724_s10 }
 0x2e4   :  { %825 = vrot.lane.b32.xlu1 %v1844_v24, %s1724_s10 }
 0x338   :  { %v360_v44 = vpop.xlane.xlu0 %359 }
 0x339   :  { %1664 = vrcp.f32 %v360_v44 }
 0x33c   :  { %v363_v45 = vpop.xlane.xlu1 %362  ;;  %v540_v54 = vpop.permute.xlu0 %539 }
 0x33d   :  { %1666 = vrcp.f32 %v363_v45 }
 0x340   :  { %v371_v46 = vpop.permute.xlu1 %370 }
 0x341   :  { %1575 = vmatprep.subr.mxu0 %v371_v46 }
 0x342   :  { %1576 = vmatpush3.msra.mxu0 %v371_v46 }
 0x344   :  { %v369_v47 = vpop.permute.xlu1 %368 }
 0x345   :  { %1577 = vmatprep.subr.mxu0 %v369_v47 }
 0x346   :  { %v1665_v48 = vpop.eup %1664  ;;  %1578 = vmatpush3.msra.mxu0 %v369_v47 }
 0x347   :  { %v366_v49 = vmul.f32 %v1665_v48, %v1661_v40 }
 0x348   :  { %v546_v50 = vpop.permute.xlu1 %545 }
 0x349   :  { %1579 = vmatprep.mubr.msk.f32.mxu0 %vm345_vm2, %v366_v49  ;;  %1587 = vmatprep.subr.msk.mxu0 %vm259_vm1, %v546_v50 }
 0x34a   :  { %v1667_v51 = vpop.eup %1666 }
 0x34b   :  { %v367_v52 = vmul.f32 %v1667_v51, %v1663_v42 }
 0x34c   :  { %v544_v53 = vpop.permute.xlu1 %543 }
 0x34d   :  { %1580 = vmatmul.mubr.msk.f32.vlgmr.msra.gmra.mxu0 %vm345_vm2, %v367_v52 }
 0x34e   :  { %1588 = vmatpush3.xpose.msk.msra.mxu0 %vm259_vm1, %v546_v50  ;;  %1591 = vmatprep.mubr.msk.f32.mxu0 %vm259_vm1, %v540_v54 }
 0x34f   :  { %1589 = vmatprep.subr.msk.mxu0 %vm259_vm1, %v544_v53 }
 0x350   :  { %v542_v55 = vpop.permute.xlu1 %541 }
 0x352   :  { %1590 = vmatpush3.xpose.msk.msra.mxu0 %vm259_vm1, %v544_v53 }
 0x354   :  { %v830_v56 = vpop.permute.xlu1 %829 }
 0x355   :  { %1592 = vmatmul.mubr.msk.f32.vlgmr.msra.gmra.mxu0 %vm259_vm1, %v542_v55  ;;  %1606 = vmatprep.subr.msk.mxu0 %vm259_vm1, %v830_v56 }
 0x356   :  { %1607 = vmatpush3.xpose.msk.msra.mxu0 %vm259_vm1, %v830_v56 }
 0x358   :  { %v828_v57 = vpop.permute.xlu1 %827 }
 0x359   :  { %1608 = vmatprep.subr.msk.mxu0 %vm259_vm1, %v828_v57 }
 0x35a   :  { %1609 = vmatpush3.xpose.msk.msra.mxu0 %vm259_vm1, %v828_v57 }
 0x35c   :  { %v824_v58 = vpop.permute.xlu1 %823 }
 0x35d   :  { %1610 = vmatprep.mubr.msk.f32.mxu0 %vm259_vm1, %v824_v58 }
 0x360   :  { %v826_v59 = vpop.permute.xlu1 %825 }
 0x361   :  { %1611 = vmatmul.mubr.msk.f32.vlgmr.msra.gmra.mxu0 %vm259_vm1, %v826_v59 }
 0x40d   :  { %v1896_v62 = vpop.f32.mrf.mxu0 }
 0x40f   :  { %v1898_v63 = vpop.f32.mrf.mxu0 }
 0x415   :  { %v1593_v0 = vpop.f32.mrf.mxu0 }
 0x416   :  { %v627_v1 = vadd.f32 %v1593_v0, %v1858_v28 }
 0x417   :  { %v621_v2 = vpop.f32.mrf.mxu0 }
 0x418   :  { %v622_v3 = vadd.f32 %v621_v2, %v1853_v27  ;;  %v633_v4 = vsel %vm345_vm2, %v627_v1, -inf }
 0x419   :  { %634 = vmax.xlane.f32.xlu1 %v633_v4 }
 0x41a   :  { %v630_v5 = vsel %vm345_vm2, %v622_v3, -inf }
 0x41b   :  { %631 = vmax.xlane.f32.xlu0 %v630_v5  ;;  %v1458_v5 = vld [vmem:[%s2025_s5] ss:$0 sm:$0xff] }
 0x421   :  { %v1612_v25 = vpop.f32.mrf.mxu0 }
 0x422   :  { %v911_v30 = vadd.f32 %v1612_v25, %v1858_v28 }
 0x423   :  { %v905_v53 = vpop.f32.mrf.mxu0 }
 0x424   :  { %v917_v31 = vsel %vm345_vm2, %v911_v30, -inf  ;;  %v906_v54 = vadd.f32 %v905_v53, %v1853_v27 }
 0x426   :  { %v914_v55 = vsel %vm345_vm2, %v906_v54, -inf }
 0x42a   :  { %163 = vrot.lane.b32.xlu1 %v138_v12, %s1725_s23 }
 0x42e   :  { %167 = vrot.lane.b32.xlu1 %v140_v23, %s1725_s23 }
 0x431   :  { %165 = vrot.lane.b32.xlu0 %v139_v26, %s1725_s23 }
 0x432   :  { %169 = vrot.lane.b32.xlu1 %v141_v29, %s1725_s23 }
 0x436   :  { %652 = vrot.lane.b32.xlu1 %v1826_v17, %s1726_s27 }
 0x43a   :  { %1111 = vrot.lane.b32.xlu1 %v1826_v17, %s1727_s28 }
 0x43e   :  { %1109 = vrot.lane.b32.xlu1 %v1844_v24, %s1728_s1 }
 0x462   :  { %918 = vmax.xlane.f32.xlu1 %v917_v31 }
 0x473   :  { %938 = vrot.lane.b32.xlu1 %v1833_v21, %s1729_s29 }
 0x4a2   :  { %v635_v32 = vpop.xlane.xlu1 %634 }
 0x4a3   :  { %v637_v33 = vsub.f32 %v627_v1, %v635_v32 }
 0x4a4   :  { %v632_v34 = vpop.xlane.xlu0 %631 }
 0x4a5   :  { %v640_v35 = vmul.f32 1.442695, %v637_v33  ;;  %v636_v36 = vsub.f32 %v622_v3, %v632_v34 }
 0x4a6   :  { %v164_v37 = vpop.permute.xlu1 %163 }
 0x4a7   :  { %1668 = vpow2.f32 %v640_v35  ;;  %v638_v38 = vmul.f32 1.442695, %v636_v36 }
 0x4a8   :  { %v166_v24 = vpop.permute.xlu0 %165 }
 0x4a9   :  { %1670 = vpow2.f32 %v638_v38  ;;  %v171_v39 = vsel %vm52_vm0, %v164_v37, %v166_v24  ;;  %v1023_v37 = vld [vmem:[%s2024_s4 + $0x10] sm:$0xff] }
 0x4aa   :  { %1565 = vmatprep.mubr.msk.f32.mxu1 %vm173_vm3, %v171_v39  ;;  %v168_v40 = vpop.permute.xlu1 %167 }
 0x4ae   :  { %v170_v41 = vpop.permute.xlu1 %169 }
 0x4af   :  { %v172_v42 = vsel %vm52_vm0, %v168_v40, %v170_v41 }
 0x4b0   :  { %1566 = vmatmul.mubr.msk.f32.vlgmr.msra.gmra.mxu1 %vm173_vm3, %v172_v42 }
 0x4b1   :  { %1584 = vmatprep.mubr.msk.f32.mxu1 %vm259_vm1, %v1898_v63  ;;  %1583 = vmatpush3.msra.mxu1 %v455_v18 }
 0x4b2   :  { %v653_v47 = vpop.permute.xlu1 %652 }
 0x4b4   :  { %v1669_v43 = vpop.eup %1668  ;;  %1585 = vmatmul.mubr.msk.f32.vlgmr.msra.gmra.mxu1 %vm259_vm1, %v1896_v62 }
 0x4b5   :  { %v645_v44 = vsel %vm345_vm2, %v1669_v43, 0.0 }
 0x4b6   :  { %v1671_v45 = vpop.eup %1670  ;;  %646 = vadd.xlane.f32.xlu0 %v645_v44  ;;  %v1112_v48 = vpop.permute.xlu1 %1111 }
 0x4b7   :  { %v642_v46 = vsel %vm345_vm2, %v1671_v45, 0.0 }
 0x4ba   :  { %643 = vadd.xlane.f32.xlu0 %v642_v46  ;;  %v1110_v49 = vpop.permute.xlu1 %1109 }
 0x4d0   :  { %654 = vrot.lane.b32.xlu0 %v1833_v21, %s1726_s27 }
 0x4d4   :  { %1113 = vrot.lane.b32.xlu0 %v1833_v21, %s1727_s28 }
 0x4d8   :  { %1107 = vrot.lane.b32.xlu0 %v1831_v19, %s1728_s1 }
 0x4eb   :  { %v919_v50 = vpop.xlane.xlu1 %918 }
 0x4ec   :  { %v921_v51 = vsub.f32 %v911_v30, %v919_v50 }
 0x4ee   :  { %v924_v52 = vmul.f32 1.442695, %v921_v51 }
 0x4ef   :  { %v939_v3 = vpop.permute.xlu1 %938 }
 0x4f0   :  { %1672 = vpow2.f32 %v924_v52 }
 0x4f7   :  { %915 = vmax.xlane.f32.xlu0 %v914_v55 }
 0x4fd   :  { %v1957_v56 = vpop.eup %1672 }
 0x4fe   :  { %v929_v57 = vsel %vm345_vm2, %v1957_v56, 0.0 }
 0x4ff   :  { %930 = vadd.xlane.f32.xlu0 %v929_v57 }
 0x53f   :  { %v647_v19 = vpop.xlane.xlu0 %646 }
 0x540   :  { %1674 = vrcp.f32 %v647_v19 }
 0x543   :  { %v644_v58 = vpop.xlane.xlu0 %643 }
 0x544   :  { %1676 = vrcp.f32 %v644_v58 }
 0x547   :  { %v655_v59 = vpop.permute.xlu0 %654 }
 0x548   :  { %1594 = vmatprep.subr.mxu1 %v655_v59 }
 0x549   :  { %1595 = vmatpush3.msra.mxu1 %v655_v59 }
 0x54a   :  { %1596 = vmatprep.subr.mxu1 %v653_v47 }
 0x54b   :  { %v1114_v61 = vpop.permute.xlu0 %1113  ;;  %1597 = vmatpush3.msra.mxu1 %v653_v47 }
 0x54c   :  { %1625 = vmatprep.subr.msk.mxu0 %vm259_vm1, %v1114_v61  ;;  %1601 = vmatprep.subr.mxu1 %v739_v60 }
 0x54d   :  { %1626 = vmatpush3.xpose.msk.msra.mxu0 %vm259_vm1, %v1114_v61  ;;  %v1675_v63 = vpop.eup %1674 }
 0x54e   :  { %1627 = vmatprep.subr.msk.mxu0 %vm259_vm1, %v1112_v48  ;;  %v651_v2 = vmul.f32 %v1675_v63, %v1669_v43 }
 0x54f   :  { %v1108_v62 = vpop.permute.xlu0 %1107 }
 0x550   :  { %1629 = vmatprep.mubr.msk.f32.mxu0 %vm259_vm1, %v1108_v62 }
 0x551   :  { %v1677_v0 = vpop.eup %1676  ;;  %1628 = vmatpush3.xpose.msk.msra.mxu0 %vm259_vm1, %v1112_v48 }
 0x552   :  { %v650_v1 = vmul.f32 %v1677_v0, %v1671_v45 }
 0x554   :  { %1598 = vmatprep.mubr.msk.f32.mxu1 %vm345_vm2, %v650_v1  ;;  %1630 = vmatmul.mubr.msk.f32.vlgmr.msra.gmra.mxu0 %vm259_vm1, %v1110_v49 }
 0x555   :  { %1599 = vmatmul.mubr.msk.f32.vlgmr.msra.gmra.mxu1 %vm345_vm2, %v651_v2 }
 0x556   :  { %1602 = vmatpush3.msra.mxu1 %v739_v60  ;;  %v1307_v60 = vld [vmem:[%s2024_s4 + $0x18] sm:$0xff] }
 0x557   :  { %1613 = vmatprep.subr.mxu1 %v939_v3 }
 0x570   :  { %v1567_v4 = vpop.f32.mrf.mxu1 }
 0x571   :  { %v250_v7 = vadd.f32 %v1567_v4, %v1458_v5 }
 0x572   :  { %v244_v6 = vpop.f32.mrf.mxu1 }
 0x573   :  { %v245_v47 = vadd.f32 %v1458_v5, %v244_v6 }
 0x574   :  { %v1586_v8 = vpop.f32.mrf.mxu1 }
 0x575   :  { %v538_v11 = vadd.f32 %v1586_v8, %v250_v7 }
 0x576   :  { %v528_v20 = vpop.f32.mrf.mxu1 }
 0x577   :  { %v537_v49 = vadd.f32 %v528_v20, %v245_v47 }
 0x580   :  { %v916_v13 = vpop.xlane.xlu0 %915 }
 0x581   :  { %v920_v12 = vsub.f32 %v906_v54, %v916_v13 }
 0x583   :  { %v922_v15 = vmul.f32 1.442695, %v920_v12 }
 0x585   :  { %1678 = vpow2.f32 %v922_v15 }
 0x588   :  { %v931_v31 = vpop.xlane.xlu0 %930 }
 0x589   :  { %1680 = vrcp.f32 %v931_v31 }
 0x592   :  { %v1679_v14 = vpop.eup %1678 }
 0x593   :  { %v926_v16 = vsel %vm345_vm2, %v1679_v14, 0.0 }
 0x594   :  { %927 = vadd.xlane.f32.xlu0 %v926_v16 }
 0x5aa   :  { %936 = vrot.lane.b32.xlu0 %v1826_v17, %s1729_s29 }
 0x614   :  { %v1631_v22 = vpop.f32.mrf.mxu0 }
 0x615   :  { %v1195_v23 = vadd.f32 %v1631_v22, %v1858_v28  ;;  %v1600_v26 = vpop.f32.mrf.mxu1 }
 0x616   :  { %v1189_v29 = vpop.f32.mrf.mxu0 }
 0x617   :  { %v1190_v18 = vadd.f32 %v1189_v29, %v1853_v27  ;;  %v730_v25 = vpop.f32.mrf.mxu1  ;;  %v1201_v30 = vsel %vm345_vm2, %v1195_v23, -inf  ;;  %v1681_v27 = vpop.eup %1680 }
 0x618   :  { %1603 = vmatprep.mubr.msk.f32.mxu1 %vm259_vm1, %v730_v25  ;;  %1202 = vmax.xlane.f32.xlu0 %v1201_v30  ;;  %v935_v36 = vmul.f32 %v1681_v27, %v1957_v56 }
 0x619   :  { %1604 = vmatmul.mubr.msk.f32.vlgmr.msra.gmra.mxu1 %vm259_vm1, %v1600_v26  ;;  %v1198_v32 = vsel %vm345_vm2, %v1190_v18, -inf }
 0x61a   :  { %1614 = vmatpush3.msra.mxu1 %v939_v3  ;;  %1199 = vmax.xlane.f32.xlu1 %v1198_v32 }
 0x61d   :  { %v928_v33 = vpop.xlane.xlu0 %927 }
 0x61e   :  { %1682 = vrcp.f32 %v928_v33 }
 0x621   :  { %v937_v28 = vpop.permute.xlu0 %936 }
 0x622   :  { %1615 = vmatprep.subr.mxu1 %v937_v28 }
 0x623   :  { %1616 = vmatpush3.msra.mxu1 %v937_v28  ;;  %v1493_v28 = vld [vmem:[%s2026_s6] ss:$0 sm:$0xff] }
 0x624   :  { %1620 = vmatprep.subr.mxu1 %v1023_v37 }
 0x62b   :  { %v1683_v34 = vpop.eup %1682 }
 0x62c   :  { %v934_v35 = vmul.f32 %v1683_v34, %v1679_v14 }
 0x62e   :  { %1617 = vmatprep.mubr.msk.f32.mxu1 %vm345_vm2, %v934_v35  ;;  %v1494_v35 = vld [vmem:[%s2027_s7] ss:$0 sm:$0xff] }
 0x62f   :  { %1618 = vmatmul.mubr.msk.f32.vlgmr.msra.gmra.mxu1 %vm345_vm2, %v935_v36 }
 0x630   :  { %1621 = vmatpush3.msra.mxu1 %v1023_v37 }
 0x6a1   :  { %v1203_v38 = vpop.xlane.xlu0 %1202 }
 0x6a2   :  { %v1205_v24 = vsub.f32 %v1195_v23, %v1203_v38 }
 0x6a3   :  { %v1200_v39 = vpop.xlane.xlu1 %1199 }
 0x6a4   :  { %v1208_v40 = vmul.f32 1.442695, %v1205_v24  ;;  %v1204_v41 = vsub.f32 %v1190_v18, %v1200_v39 }
 0x6a6   :  { %1684 = vpow2.f32 %v1208_v40  ;;  %v1206_v42 = vmul.f32 1.442695, %v1204_v41 }
 0x6a8   :  { %1686 = vpow2.f32 %v1206_v42 }
 0x6b3   :  { %v1685_v43 = vpop.eup %1684 }
 0x6b4   :  { %v1213_v44 = vsel %vm345_vm2, %v1685_v43, 0.0 }
 0x6b5   :  { %v1687_v45 = vpop.eup %1686  ;;  %1214 = vadd.xlane.f32.xlu0 %v1213_v44 }
 0x6b6   :  { %v1210_v46 = vsel %vm345_vm2, %v1687_v45, 0.0 }
 0x6b7   :  { %1211 = vadd.xlane.f32.xlu1 %v1210_v46 }
 0x6c8   :  { %1222 = vrot.lane.b32.xlu1 %v1833_v21, %s1730_s13 }
 0x6cb   :  { %1220 = vrot.lane.b32.xlu0 %v1826_v17, %s1730_s13 }
 0x6d9   :  { %v1605_v48 = vpop.f32.mrf.mxu1 }
 0x6da   :  { %v822_v50 = vadd.f32 %v1605_v48, %v538_v11 }
 0x6db   :  { %v812_v51 = vpop.f32.mrf.mxu1 }
 0x6dc   :  { %v821_v52 = vadd.f32 %v812_v51, %v537_v49 }
 0x6ef   :  { %v1619_v53 = vpop.f32.mrf.mxu1 }
 0x6f1   :  { %v1014_v54 = vpop.f32.mrf.mxu1 }
 0x6f2   :  { %1622 = vmatprep.mubr.msk.f32.mxu1 %vm259_vm1, %v1014_v54 }
 0x6f3   :  { %1623 = vmatmul.mubr.msk.f32.vlgmr.msra.gmra.mxu1 %vm259_vm1, %v1619_v53 }
 0x73e   :  { %v1215_v55 = vpop.xlane.xlu0 %1214 }
 0x73f   :  { %1688 = vrcp.f32 %v1215_v55 }
 0x740   :  { %v1212_v56 = vpop.xlane.xlu1 %1211 }
 0x741   :  { %1690 = vrcp.f32 %v1212_v56 }
 0x742   :  { %v1221_v21 = vpop.permute.xlu0 %1220 }
 0x744   :  { %v1223_v57 = vpop.permute.xlu1 %1222 }
 0x745   :  { %1632 = vmatprep.subr.mxu1 %v1223_v57 }
 0x746   :  { %1633 = vmatpush3.msra.mxu1 %v1223_v57 }
 0x747   :  { %1634 = vmatprep.subr.mxu1 %v1221_v21 }
 0x748   :  { %1635 = vmatpush3.msra.mxu1 %v1221_v21 }
 0x749   :  { %1639 = vmatprep.subr.mxu1 %v1307_v60 }
 0x74c   :  { %v1689_v17 = vpop.eup %1688 }
 0x74d   :  { %v1219_v59 = vmul.f32 %v1689_v17, %v1685_v43 }
 0x74e   :  { %v1691_v19 = vpop.eup %1690 }
 0x74f   :  { %v1218_v58 = vmul.f32 %v1691_v19, %v1687_v45 }
 0x751   :  { %1636 = vmatprep.mubr.msk.f32.mxu1 %vm345_vm2, %v1218_v58 }
 0x752   :  { %1637 = vmatmul.mubr.msk.f32.vlgmr.msra.gmra.mxu1 %vm345_vm2, %v1219_v59 }
 0x753   :  { %1640 = vmatpush3.msra.mxu1 %v1307_v60 }
 0x7b3   :  { %v1624_v61 = vpop.f32.mrf.mxu1 }
 0x7b4   :  { %v1106_v62 = vadd.f32 %v1624_v61, %v822_v50 }
 0x7b5   :  { %v1096_v63 = vpop.f32.mrf.mxu1 }
 0x7b6   :  { %v1105_v3 = vadd.f32 %v1096_v63, %v821_v52 }
 0x812   :  { %v1638_v0 = vpop.f32.mrf.mxu1 }
 0x814   :  { %v1298_v1 = vpop.f32.mrf.mxu1 }
 0x815   :  { %1641 = vmatprep.mubr.msk.f32.mxu1 %vm259_vm1, %v1298_v1 }
 0x816   :  { %1642 = vmatmul.mubr.msk.f32.vlgmr.msra.gmra.mxu1 %vm259_vm1, %v1638_v0 }
 0x8d6   :  { %v1643_v2 = vpop.f32.mrf.mxu1 }
 0x8d7   :  { %v1390_v4 = vadd.f32 %v1643_v2, %v1106_v62 }
 0x8d8   :  { %v1380_v5 = vpop.f32.mrf.mxu1 }
 0x8d9   :  { %v1389_v6 = vadd.f32 %v1380_v5, %v1105_v3  ;;  %v1392_v7 = vadd.f32 %v1390_v4, %v1813_v10 }
 0x8db   :  { %v1396_v8 = vsel %vm52_vm0, %v1392_v7, 0.0  ;;  %v1391_v11 = vadd.f32 %v1389_v6, %v1806_v9 }
 0x8dc   :  { %1397 = vadd.xlane.f32.xlu0 %v1396_v8 }
 0x8dd   :  { %v1393_v13 = vsel %vm52_vm0, %v1391_v11, 0.0 }
 0x8de   :  { %1394 = vadd.xlane.f32.xlu1 %v1393_v13 }
 0x965   :  { %v1398_v12 = vpop.xlane.xlu0 %1397 }
 0x966   :  { %v1401_v15 = vmul.f32 0.03125, %v1398_v12 }
 0x967   :  { %v1395_v14 = vpop.xlane.xlu1 %1394 }
 0x968   :  { %v1403_v16 = vsub.f32 %v1392_v7, %v1401_v15  ;;  %v1400_v20 = vmul.f32 0.03125, %v1395_v14 }
 0x96a   :  { %v1402_v22 = vsub.f32 %v1391_v11, %v1400_v20  ;;  %v1405_v23 = vmul.f32 %v1403_v16, %v1403_v16 }
 0x96c   :  { %v1409_v26 = vsel %vm52_vm0, %v1405_v23, 0.0  ;;  %v1404_v29 = vmul.f32 %v1402_v22, %v1402_v22 }
 0x96d   :  { %1410 = vadd.xlane.f32.xlu0 %v1409_v26 }
 0x96e   :  { %v1406_v10 = vsel %vm52_vm0, %v1404_v29, 0.0 }
 0x96f   :  { %1407 = vadd.xlane.f32.xlu1 %v1406_v10 }
 0x9f6   :  { %v1411_v18 = vpop.xlane.xlu0 %1410 }
 0x9f7   :  { %v1413_v9 = vmul.f32 0.03125, %v1411_v18 }
 0x9f8   :  { %v1408_v25 = vpop.xlane.xlu1 %1407 }
 0x9f9   :  { %v1415_v30 = vadd.f32 1e-05, %v1413_v9  ;;  %v1412_v31 = vmul.f32 0.03125, %v1408_v25 }
 0x9fb   :  { %1692 = vrsqrt.f32 %v1415_v30  ;;  %v1414_v32 = vadd.f32 1e-05, %v1412_v31 }
 0x9fd   :  { %1694 = vrsqrt.f32 %v1414_v32 }
 0xa08   :  { %v1693_v33 = vpop.eup %1692 }
 0xa09   :  { %v1419_v27 = vmul.f32 %v1693_v33, %v1403_v16 }
 0xa0a   :  { %v1695_v34 = vpop.eup %1694 }
 0xa0b   :  { %v1418_v36 = vmul.f32 %v1695_v34, %v1402_v22  ;;  %v1428_v37 = vmul.f32 %v1493_v28, %v1419_v27 }
 0xa0d   :  { %v1427_v38 = vmul.f32 %v1493_v28, %v1418_v36  ;;  %v1437_v24 = vadd.f32 %v1494_v35, %v1428_v37 }
 0xa0f   :  { %v1436_v39 = vadd.f32 %v1494_v35, %v1427_v38  ;;  %1439 = vst.msk [vmem:[#allocation2 + $0x8] sm:$0xff] %vm52_vm0, %v1437_v24 }
 0xa11   :  { %1438 = vst.msk [vmem:[#allocation2] sm:$0xff] %vm52_vm0, %v1436_v39 }
 0xa12   :  { %1707 = shalt.err (!%p1704_p4)
}
 0xa13   :  { %s1732_s6 = smov 128   ;;  %s1733_s7 = smov 8  }
 0xa14   :  { %1451 = dma.vmem_to_hbm [thread:$0]  %s1446_s20, 256, %s2028_s8, [#allocation3], %s1732_s6, %s1732_s6, %s1733_s7  }
 0xa15   :  { %1716 = dma.done.wait [#allocation3], 256  }
 0xa16   :  { %1717 = vsyncadd [#allocation3], 4294967040 }
 0xa17   :  { %1455 = vsyncpa [#allocation3], 1 }

</bundles_post_ra>
